<compile_context>
chip_gen: v7x
topology: tpu7x:2x2x1
jax: 0.10.0
libtpu: 0.0.40
codegen_flags: <defaults>
</compile_context>

<pallas_src>
import jax
import jax.numpy as jnp
from jax import lax
from jax.experimental import pallas as pl
from jax.experimental.pallas import tpu as pltpu

EPS = 1e-5
LANE = 128


def _pack_rows(dtype):
    # Minimum second-minor (sublane) granularity for this dtype's packing.
    return {4: 8, 2: 16, 1: 32}.get(jnp.dtype(dtype).itemsize, 8)


def _make_kernel(*, inner, blk_rows, chunk, n_chunks, n_valid, blocks_total,
                 needs_mask):
    """Build the kernel with all tiling parameters baked in statically."""

    def kernel(pred_ref, targ_ref, inter_ref, union_ref):
        s = pl.program_id(0)   # split (core-parallel on v7x)
        i = pl.program_id(1)   # reduction axis within the split

        @pl.when(i == 0)
        def _init():
            inter_ref[...] = jnp.zeros_like(inter_ref)
            union_ref[...] = jnp.zeros_like(union_ref)

        blk_idx = s * inner + i
        base_row = blk_idx * blk_rows

        def accumulate(masked):
            acc_i = jnp.zeros((8, LANE), jnp.float32)
            acc_u = jnp.zeros((8, LANE), jnp.float32)
            # Statically unrolled chunk loop: constant slice offsets, and
            # intermediates (sigmoid result, products) stay ~chunk-sized
            # instead of block-sized -> low VMEM temp pressure.
            for c in range(n_chunks):
                r0 = c * chunk
                x = pred_ref[pl.ds(r0, chunk), :].astype(jnp.float32)
                t = targ_ref[pl.ds(r0, chunk), :].astype(jnp.float32)
                # Single-EUP sigmoid: sigmoid(x) == 0.5*(tanh(0.5*x)+1).
                p = 0.5 * (jnp.tanh(0.5 * x) + 1.0)
                inter_c = p * t
                union_c = p + t
                if masked:
                    rid = (base_row + r0
                           + lax.broadcasted_iota(jnp.int32, (chunk, LANE), 0))
                    cid = lax.broadcasted_iota(jnp.int32, (chunk, LANE), 1)
                    valid = rid * LANE + cid < n_valid
                    inter_c = jnp.where(valid, inter_c, 0.0)
                    union_c = jnp.where(valid, union_c, 0.0)
                # Elementwise (VPU-only) reduce of the chunk into an (8,128)
                # vreg-shaped partial accumulator.
                acc_i = acc_i + inter_c.reshape(chunk // 8, 8, LANE).sum(axis=0)
                acc_u = acc_u + union_c.reshape(chunk // 8, 8, LANE).sum(axis=0)
            inter_ref[...] += acc_i
            union_ref[...] += acc_u

        if not needs_mask:
            accumulate(masked=False)
        else:
            @pl.when(blk_idx < blocks_total - 1)
            def _full_blocks():
                accumulate(masked=False)

            @pl.when(blk_idx == blocks_total - 1)
            def _tail_block():
                accumulate(masked=True)
            # blk_idx >= blocks_total: duplicated (clamped) blocks contribute
            # nothing -- accumulators are untouched.

    return kernel


def dice_loss(predict, target, *, block_rows=8192, chunk_rows=512,
              num_splits=1, core_parallel=False):
    """Dice loss.  On v7x pass num_splits=2, core_parallel=True (two TCs)."""
    assert predict.shape == target.shape, (
        "the size of predict and target must be equal.")

    n_valid = int(predict.size)
    assert n_valid < 2 ** 31, "element-index mask uses int32"
    sub = max(_pack_rows(predict.dtype), _pack_rows(target.dtype))

    pred_flat = predict.reshape(-1)   # free: contiguous flatten
    targ_flat = target.reshape(-1)

    # Lane padding only when n % 128 != 0 (< 128 elems, but costs one copy).
    lane_pad = (-n_valid) % LANE
    rows = (n_valid + lane_pad) // LANE

    # Block row count: multiple of the sublane packing, never above the array.
    if rows >= block_rows:
        blk_rows = max(sub, block_rows - block_rows % sub)
    else:
        blk_rows = max(sub, rows - rows % sub)

    row_pad = 0
    if rows < blk_rows:               # only for tiny inputs (rows < sub)
        row_pad = blk_rows - rows
        rows = blk_rows

    total_pad = lane_pad + row_pad * LANE
    if total_pad:
        pred_flat = jnp.pad(pred_flat, (0, total_pad))
        targ_flat = jnp.pad(targ_flat, (0, total_pad))

    pred2 = pred_flat.reshape(rows, LANE)   # free when total_pad == 0
    targ2 = targ_flat.reshape(rows, LANE)

    chunk = min(chunk_rows, blk_rows)
    if blk_rows % chunk:
        chunk = blk_rows                    # fall back to one chunk per block
    assert chunk % 8 == 0
    n_chunks = blk_rows // chunk

    blocks_total = pl.cdiv(rows, blk_rows)
    inner = pl.cdiv(blocks_total, num_splits)
    coverage_elems = num_splits * inner * blk_rows * LANE
    needs_mask = coverage_elems != n_valid

    last_block = blocks_total - 1
    if num_splits * inner == blocks_total:
        in_map = lambda s, i: (s * inner + i, 0)
    else:
        # Clamp duplicated trailing blocks into range; they are masked to zero
        # in-kernel (mask uses the *logical* program-id-derived row index).
        in_map = lambda s, i: (jnp.minimum(s * inner + i, last_block), 0)
    out_map = lambda s, i: (s, 0, 0)

    kernel = _make_kernel(
        inner=inner, blk_rows=blk_rows, chunk=chunk, n_chunks=n_chunks,
        n_valid=n_valid, blocks_total=blocks_total, needs_mask=needs_mask)

    in_bytes = 2 * blk_rows * LANE * (
        jnp.dtype(predict.dtype).itemsize + jnp.dtype(target.dtype).itemsize)
    vmem_limit = max(32 * 1024 * 1024, int(1.5 * in_bytes) + (4 << 20))

    split_sem = pltpu.CORE_PARALLEL if core_parallel else pltpu.PARALLEL

    inter_part, union_part = pl.pallas_call(
        kernel,
        out_shape=(
            jax.ShapeDtypeStruct((num_splits, 8, LANE), jnp.float32),
            jax.ShapeDtypeStruct((num_splits, 8, LANE), jnp.float32),
        ),
        grid_spec=pltpu.PrefetchScalarGridSpec(
            num_scalar_prefetch=0,
            grid=(num_splits, inner),
            in_specs=[
                pl.BlockSpec((blk_rows, LANE), in_map),
                pl.BlockSpec((blk_rows, LANE), in_map),
            ],
            out_specs=(
                pl.BlockSpec((None, 8, LANE), out_map),
                pl.BlockSpec((None, 8, LANE), out_map),
            ),
        ),
        compiler_params=pltpu.CompilerParams(
            dimension_semantics=(split_sem, pltpu.ARBITRARY),
            vmem_limit_bytes=vmem_limit,
        ),
    )(pred2, targ2)

    inter = jnp.sum(inter_part)
    union = jnp.sum(union_part)
    return 1.0 - 2.0 * (inter + EPS) / (union + EPS)


def _dice_loss_ref(predict, target):
    num = predict.shape[0]
    pre = jax.nn.sigmoid(predict.astype(jnp.float32)).reshape(num, -1)
    tar = target.astype(jnp.float32).reshape(num, -1)
    intersection = (pre * tar).sum(-1).sum()
    union = (pre + tar).sum(-1).sum()
    return 1.0 - 2.0 * (intersection + EPS) / (union + EPS)


if __name__ == "__main__":
    key = jax.random.PRNGKey(0)
    ks = jax.random.split(key, 9)

    def check(pred, targ, tol=1e-5, **kw):
        out = jax.block_until_ready(dice_loss(pred, targ, **kw))
        ref = _dice_loss_ref(pred, targ)
        assert jnp.allclose(out, ref, atol=tol, rtol=tol), (out, ref, kw)

    # 1) 128-aligned NCHW input: zero-copy path, single block, no masking.
    p1 = jax.random.normal(ks[0], (2, 4, 16, 16), dtype=jnp.float32)
    t1 = (jax.random.uniform(ks[1], (2, 4, 16, 16)) > 0.5).astype(jnp.float32)
    check(p1, t1)

    # 2) Awkward unaligned shape: tiny lane/row pad + exact in-kernel masking.
    p2 = jax.random.normal(ks[2], (2, 3, 7, 5), dtype=jnp.float32)
    t2 = (jax.random.uniform(ks[3], (2, 3, 7, 5)) > 0.5).astype(jnp.float32)
    check(p2, t2)

    # 3) Multi-block accumulation + in-block chunking (small blocks force it).
    p3 = jax.random.normal(ks[4], (4, 4, 32, 32), dtype=jnp.float32)
    t3 = (jax.random.uniform(ks[5], (4, 4, 32, 32)) > 0.5).astype(jnp.float32)
    check(p3, t3, block_rows=64, chunk_rows=32)

    # 4) Partial tail block (masked) and the split axis (on v7x one would add
    #    core_parallel=True so the two splits land on the two TensorCores).
    p4 = jax.random.normal(ks[6], (3, 5, 64, 64), dtype=jnp.float32)
    t4 = (jax.random.uniform(ks[7], (3, 5, 64, 64)) > 0.5).astype(jnp.float32)
    check(p4, t4, block_rows=128)
    check(p4, t4, block_rows=128, num_splits=2)

    # 5) Narrow native dtypes (no wrapper-side f32 cast; the in-kernel astype
    #    upcasts -- int8 / bool targets are accepted the same way).
    p5 = p1.astype(jnp.bfloat16)
    t5 = (jax.random.uniform(ks[8], (2, 4, 16, 16)) > 0.5).astype(jnp.bfloat16)
    check(p5, t5, tol=1e-4)

    print("KERNEL_OK")
</pallas_src>

<mosaic_0001>
module attributes {stable_mosaic.version = 11 : i64} {
  func.func @kernel(%arg0: i32, %arg1: i32, %arg2: memref<16x128xf32, #tpu.memory_space<vmem>>, %arg3: memref<16x128xf32, #tpu.memory_space<vmem>>, %arg4: memref<1x8x128xf32, #tpu.memory_space<vmem>>, %arg5: memref<1x8x128xf32, #tpu.memory_space<vmem>>) attributes {dimension_semantics = [#tpu.dimension_semantics<parallel>, #tpu.dimension_semantics<arbitrary>], iteration_bounds = array<i64: 1, 1>, scalar_prefetch = 0 : i64, scratch_operands = 0 : i64, tpu.core_type = #tpu.core_type<tc>, window_params = [{transform_indices = @transform_0, window_bounds = array<i64: 16, 128>}, {transform_indices = @transform_1, window_bounds = array<i64: 16, 128>}, {transform_indices = @transform_2, window_bounds = array<i64: 1, 8, 128>}, {transform_indices = @transform_3, window_bounds = array<i64: 1, 8, 128>}]} {
    %c0_i32 = arith.constant 0 : i32
    %0 = arith.cmpi eq, %arg1, %c0_i32 : i32
    %1 = arith.extui %0 : i1 to i32
    %c0_i32_0 = arith.constant 0 : i32
    %2 = arith.cmpi ne, %1, %c0_i32_0 : i32
    scf.if %2 {
      %cst_22 = arith.constant 0.000000e+00 : f32
      %34 = vector.broadcast %cst_22 : f32 to vector<8x128xf32>
      %c0_23 = arith.constant 0 : index
      %c0_24 = arith.constant 0 : index
      %c0_25 = arith.constant 0 : index
      %35 = vector.load %arg4[%c0_23, %c0_24, %c0_25] : memref<1x8x128xf32, #tpu.memory_space<vmem>>, vector<1x8x128xf32>
      %36 = vector.shape_cast %35 : vector<1x8x128xf32> to vector<8x128xf32>
      %37 = vector.shape_cast %34 : vector<8x128xf32> to vector<1x8x128xf32>
      tpu.vector_store %arg4[%c0_23, %c0_24, %c0_25], %37 {strides = array<i32>} : memref<1x8x128xf32, #tpu.memory_space<vmem>>, vector<1x8x128xf32>,
      %cst_26 = arith.constant 0.000000e+00 : f32
      %38 = vector.broadcast %cst_26 : f32 to vector<8x128xf32>
      %c0_27 = arith.constant 0 : index
      %c0_28 = arith.constant 0 : index
      %c0_29 = arith.constant 0 : index
      %39 = vector.load %arg5[%c0_27, %c0_28, %c0_29] : memref<1x8x128xf32, #tpu.memory_space<vmem>>, vector<1x8x128xf32>
      %40 = vector.shape_cast %39 : vector<1x8x128xf32> to vector<8x128xf32>
      %41 = vector.shape_cast %38 : vector<8x128xf32> to vector<1x8x128xf32>
      tpu.vector_store %arg5[%c0_27, %c0_28, %c0_29], %41 {strides = array<i32>} : memref<1x8x128xf32, #tpu.memory_space<vmem>>, vector<1x8x128xf32>,
    } else {
    }
    %cst = arith.constant 0.000000e+00 : f32
    %3 = vector.broadcast %cst : f32 to vector<8x128xf32>
    %cst_1 = arith.constant 0.000000e+00 : f32
    %4 = vector.broadcast %cst_1 : f32 to vector<8x128xf32>
    %c0 = arith.constant 0 : index
    %c0_2 = arith.constant 0 : index
    %5 = vector.load %arg2[%c0, %c0_2] : memref<16x128xf32, #tpu.memory_space<vmem>>, vector<16x128xf32>
    %c0_3 = arith.constant 0 : index
    %c0_4 = arith.constant 0 : index
    %6 = vector.load %arg3[%c0_3, %c0_4] : memref<16x128xf32, #tpu.memory_space<vmem>>, vector<16x128xf32>
    %cst_5 = arith.constant 5.000000e-01 : f32
    %7 = vector.broadcast %cst_5 : f32 to vector<16x128xf32>
    %8 = arith.mulf %7, %5 : vector<16x128xf32>
    %9 = math.tanh %8 : vector<16x128xf32>
    %cst_6 = arith.constant 1.000000e+00 : f32
    %10 = vector.broadcast %cst_6 : f32 to vector<16x128xf32>
    %11 = arith.addf %9, %10 : vector<16x128xf32>
    %cst_7 = arith.constant 5.000000e-01 : f32
    %12 = vector.broadcast %cst_7 : f32 to vector<16x128xf32>
    %13 = arith.mulf %12, %11 : vector<16x128xf32>
    %14 = arith.mulf %13, %6 : vector<16x128xf32>
    %15 = arith.addf %13, %6 : vector<16x128xf32>
    %16 = vector.shape_cast %14 : vector<16x128xf32> to vector<2x8x128xf32>
    %cst_8 = arith.constant dense<0.000000e+00> : vector<8x128xf32>
    %17 = vector.multi_reduction <add>, %16, %cst_8 [0] : vector<2x8x128xf32> to vector<8x128xf32>
    %18 = arith.addf %3, %17 : vector<8x128xf32>
    %19 = vector.shape_cast %15 : vector<16x128xf32> to vector<2x8x128xf32>
    %cst_9 = arith.constant dense<0.000000e+00> : vector<8x128xf32>
    %20 = vector.multi_reduction <add>, %19, %cst_9 [0] : vector<2x8x128xf32> to vector<8x128xf32>
    %21 = arith.addf %4, %20 : vector<8x128xf32>
    %c0_10 = arith.constant 0 : index
    %c0_11 = arith.constant 0 : index
    %c0_12 = arith.constant 0 : index
    %22 = vector.load %arg4[%c0_10, %c0_11, %c0_12] : memref<1x8x128xf32, #tpu.memory_space<vmem>>, vector<1x8x128xf32>
    %23 = vector.shape_cast %22 : vector<1x8x128xf32> to vector<8x128xf32>
    %24 = arith.addf %23, %18 : vector<8x128xf32>
    %c0_13 = arith.constant 0 : index
    %c0_14 = arith.constant 0 : index
    %c0_15 = arith.constant 0 : index
    %25 = vector.load %arg4[%c0_13, %c0_14, %c0_15] : memref<1x8x128xf32, #tpu.memory_space<vmem>>, vector<1x8x128xf32>
    %26 = vector.shape_cast %25 : vector<1x8x128xf32> to vector<8x128xf32>
    %27 = vector.shape_cast %24 : vector<8x128xf32> to vector<1x8x128xf32>
    tpu.vector_store %arg4[%c0_13, %c0_14, %c0_15], %27 {strides = array<i32>} : memref<1x8x128xf32, #tpu.memory_space<vmem>>, vector<1x8x128xf32>,
    %c0_16 = arith.constant 0 : index
    %c0_17 = arith.constant 0 : index
    %c0_18 = arith.constant 0 : index
    %28 = vector.load %arg5[%c0_16, %c0_17, %c0_18] : memref<1x8x128xf32, #tpu.memory_space<vmem>>, vector<1x8x128xf32>
    %29 = vector.shape_cast %28 : vector<1x8x128xf32> to vector<8x128xf32>
    %30 = arith.addf %29, %21 : vector<8x128xf32>
    %c0_19 = arith.constant 0 : index
    %c0_20 = arith.constant 0 : index
    %c0_21 = arith.constant 0 : index
    %31 = vector.load %arg5[%c0_19, %c0_20, %c0_21] : memref<1x8x128xf32, #tpu.memory_space<vmem>>, vector<1x8x128xf32>
    %32 = vector.shape_cast %31 : vector<1x8x128xf32> to vector<8x128xf32>
    %33 = vector.shape_cast %30 : vector<8x128xf32> to vector<1x8x128xf32>
    tpu.vector_store %arg5[%c0_19, %c0_20, %c0_21], %33 {strides = array<i32>} : memref<1x8x128xf32, #tpu.memory_space<vmem>>, vector<1x8x128xf32>,
    return
  }
  func.func @transform_0(%arg0: i32, %arg1: i32) -> (i32, i32) {
    %c1_i32 = arith.constant 1 : i32
    %0 = arith.muli %arg0, %c1_i32 : i32
    %1 = arith.addi %0, %arg1 : i32
    %c0_i32 = arith.constant 0 : i32
    %c0_i32_0 = arith.constant 0 : i32
    return %1, %c0_i32 : i32, i32
  }
  func.func @transform_1(%arg0: i32, %arg1: i32) -> (i32, i32) {
    %c1_i32 = arith.constant 1 : i32
    %0 = arith.muli %arg0, %c1_i32 : i32
    %1 = arith.addi %0, %arg1 : i32
    %c0_i32 = arith.constant 0 : i32
    %c0_i32_0 = arith.constant 0 : i32
    return %1, %c0_i32 : i32, i32
  }
  func.func @transform_2(%arg0: i32, %arg1: i32) -> (i32, i32, i32) {
    %c0_i32 = arith.constant 0 : i32
    %c0_i32_0 = arith.constant 0 : i32
    %c0_i32_1 = arith.constant 0 : i32
    return %arg0, %c0_i32, %c0_i32_0 : i32, i32, i32
  }
  func.func @transform_3(%arg0: i32, %arg1: i32) -> (i32, i32, i32) {
    %c0_i32 = arith.constant 0 : i32
    %c0_i32_0 = arith.constant 0 : i32
    %c0_i32_1 = arith.constant 0 : i32
    return %arg0, %c0_i32, %c0_i32_0 : i32, i32, i32
  }
}

</mosaic_0001>

<bundles_post_ra>
// kernel: tpu_custom_call.1
= control target key start
LH: loop header
LB: loop body
LE: loop exit
PB: predicated region body
PF: predicated region fallthrough
CT: control target
= control target key end

     0   :  { %9 = vsyncpa [#allocation3], 0  ;;  %s298_s0 = inlined_call_operand.hbm [shape: f32[16,128], index: 0, kind: input, shape index: {}]   ;;  %s299_s1 = inlined_call_operand.hbm [shape: f32[16,128], index: 1, kind: input, shape index: {}]   ;;  %s300_s2 = inlined_call_operand.hbm [shape: f32[1,8,128], index: 2, kind: output, shape index: {0}]   ;;  %s301_s3 = inlined_call_operand.hbm [shape: f32[1,8,128], index: 3, kind: output, shape index: {1}]  }
   0x1   :  { %10 = vsyncpa [#allocation6], 0 }
   0x2   :  { %11 = vsyncpa [#allocation4], 0 }
   0x3   :  { %12 = vsyncpa [#allocation9], 0  ;;  %s224_s12 = smov [#allocation2]   ;;  %s128_s16 = scalar_lea.hbm %s298_s0, 256 }
   0x4   :  { %s22_s13 = sshll.u32 %s224_s12, 4  ;;  %p129_p0 = scmp.ne.s32.totalorder %s298_s0, %s128_s16  ;;  %s23_s13 = int_to_ptr.vmem [resolvable:$true] %s22_s13 }
   0x5   :  { %p132_p1 = scmp.lt.u32.totalorder %s128_s16, %s298_s0 }
   0x7   :  { %p134_p2 = pnand %p132_p1, %p129_p0 }
   0x9   :  { %137 = shalt.err (!%p134_p2)
}
   0xa   :  { %s138_s21 = scalar_lea.vmem %s23_s13, 256  ;;  %p143_p4 = scmp.lt.s32.totalorder %s23_s13, %s23_s13 }
   0xb   :  { %p139_p3 = scmp.ne.s32.totalorder %s23_s13, %s138_s21  ;;  %p144_p5 = scmp.lt.s32.totalorder %s138_s21, %s138_s21 }
   0xd   :  { %p145_p6 = por %p144_p5, %p143_p4 }
   0xf   :  { %p146_p7 = pnand %p145_p6, %p139_p3 }
  0x11   :  { %149 = shalt.err (!%p146_p7)
}
  0x12   :  { %s225_s22 = smov 128   ;;  %s226_s23 = smov 8  }
  0x13   :  { %28 = dma.hbm_to_vmem [thread:$0]  %s298_s0, 256, %s23_s13, [#allocation3], %s225_s22, %s225_s22, %s226_s23  }
  0x14   :  { %s227_s26 = smov [#allocation5]   ;;  %s150_s30 = scalar_lea.hbm %s299_s1, 256 }
  0x15   :  { %s38_s27 = sshll.u32 %s227_s26, 4  ;;  %p151_p8 = scmp.ne.s32.totalorder %s299_s1, %s150_s30  ;;  %s39_s27 = int_to_ptr.vmem [resolvable:$true] %s38_s27 }
  0x16   :  { %p154_p9 = scmp.lt.u32.totalorder %s150_s30, %s299_s1 }
  0x18   :  { %p156_p10 = pnand %p154_p9, %p151_p8 }
  0x1a   :  { %159 = shalt.err (!%p156_p10)
}
  0x1b   :  { %s160_s8 = scalar_lea.vmem %s39_s27, 256  ;;  %p165_p12 = scmp.lt.s32.totalorder %s39_s27, %s39_s27 }
  0x1c   :  { %p161_p11 = scmp.ne.s32.totalorder %s39_s27, %s160_s8  ;;  %p166_p13 = scmp.lt.s32.totalorder %s160_s8, %s160_s8 }
  0x1e   :  { %p167_p0 = por %p166_p13, %p165_p12 }
  0x20   :  { %p168_p1 = pnand %p167_p0, %p161_p11 }
  0x22   :  { %171 = shalt.err (!%p168_p1)
}
  0x23   :  { %44 = dma.hbm_to_vmem [thread:$0]  %s299_s1, 256, %s39_s27, [#allocation6], %s225_s22, %s225_s22, %s226_s23  }
  0x24   :  { %216 = dma.done.wait [#allocation3], 256  }
  0x25   :  { %217 = vsyncadd [#allocation3], 4294967040 }
  0x26   :  { %218 = dma.done.wait [#allocation6], 256  }
  0x27   :  { %219 = vsyncadd [#allocation6], 4294967040  ;;  %v61_v0 = vld [vmem:[#allocation2] sm:$0xff]  ;;  %v62_v1 = vld [vmem:[#allocation2 + $0x8] sm:$0xff]  ;;  %s228_s1 = smov [#allocation7]   ;;  %s229_s11 = smov [#allocation8]  }
  0x28   :  { %v65_v2 = vmul.f32 0.5, %v61_v0  ;;  %v66_v3 = vmul.f32 0.5, %v62_v1  ;;  %v63_v7 = vld [vmem:[#allocation5] sm:$0xff]  ;;  %v64_v9 = vld [vmem:[#allocation5 + $0x8] sm:$0xff]  ;;  %s93_s10 = sshll.u32 %s228_s1, 4  ;;  %s103_s12 = sshll.u32 %s229_s11, 4  ;;  %s94_s10 = int_to_ptr.vmem [resolvable:$true] %s93_s10  ;;  %s104_s12 = int_to_ptr.vmem [resolvable:$true] %s103_s12 }
  0x29   :  { %s172_s13 = scalar_lea.vmem %s94_s10, 128  ;;  %p177_p3 = scmp.lt.s32.totalorder %s94_s10, %s94_s10 }
  0x2a   :  { %124 = vtanh.f32 %v65_v2  ;;  %p173_p2 = scmp.ne.s32.totalorder %s94_s10, %s172_s13  ;;  %p178_p4 = scmp.lt.s32.totalorder %s172_s13, %s172_s13 }
  0x2b   :  { %126 = vtanh.f32 %v66_v3 }
  0x2c   :  { %p179_p5 = por %p178_p4, %p177_p3 }
  0x2e   :  { %p180_p6 = pnand %p179_p5, %p173_p2 }
  0x34   :  { %v125_v4 = vpop.eup %124 }
  0x35   :  { %v127_v5 = vpop.eup %126  ;;  %v69_v6 = vadd.f32 1.0, %v125_v4 }
  0x36   :  { %v70_v8 = vadd.f32 1.0, %v127_v5 }
  0x37   :  { %v71_v10 = vmul.f32 0.5, %v69_v6 }
  0x38   :  { %v72_v11 = vmul.f32 0.5, %v70_v8 }
  0x39   :  { %v73_v12 = vmul.f32 %v71_v10, %v63_v7  ;;  %v75_v13 = vadd.f32 %v71_v10, %v63_v7 }
  0x3a   :  { %v74_v14 = vmul.f32 %v72_v11, %v64_v9  ;;  %v76_v15 = vadd.f32 %v72_v11, %v64_v9 }
  0x3c   :  { %v77_v16 = vadd.f32 %v74_v14, %v73_v12  ;;  %v79_v17 = vadd.f32 %v76_v15, %v75_v13 }
  0x3e   :  { %83 = vst [vmem:[#allocation7] sm:$0xff] %v77_v16  ;;  %86 = vst [vmem:[#allocation8] sm:$0xff] %v79_v17 }
  0x3f   :  { %183 = shalt.err (!%p180_p6)
}
  0x40   :  { %s184_s16 = scalar_lea.hbm %s300_s2, 128 }
  0x41   :  { %p185_p7 = scmp.ne.s32.totalorder %s300_s2, %s184_s16  ;;  %p188_p8 = scmp.lt.u32.totalorder %s184_s16, %s300_s2 }
  0x43   :  { %p190_p9 = pnand %p188_p8, %p185_p7 }
  0x45   :  { %193 = shalt.err (!%p190_p9)
}
  0x46   :  { %96 = dma.vmem_to_hbm [thread:$0]  %s94_s10, 128, %s300_s2, [#allocation4]  }
  0x47   :  { %s194_s23 = scalar_lea.vmem %s104_s12, 128  ;;  %p199_p11 = scmp.lt.s32.totalorder %s104_s12, %s104_s12 }
  0x48   :  { %p195_p10 = scmp.ne.s32.totalorder %s104_s12, %s194_s23  ;;  %p200_p12 = scmp.lt.s32.totalorder %s194_s23, %s194_s23 }
  0x4a   :  { %p201_p13 = por %p200_p12, %p199_p11 }
  0x4c   :  { %p202_p0 = pnand %p201_p13, %p195_p10 }
  0x4e   :  { %205 = shalt.err (!%p202_p0)
}
  0x4f   :  { %s206_s26 = scalar_lea.hbm %s301_s3, 128 }
  0x50   :  { %p207_p1 = scmp.ne.s32.totalorder %s301_s3, %s206_s26  ;;  %p210_p2 = scmp.lt.u32.totalorder %s206_s26, %s301_s3 }
  0x52   :  { %p212_p3 = pnand %p210_p2, %p207_p1 }
  0x54   :  { %215 = shalt.err (!%p212_p3)
}
  0x55   :  { %106 = dma.vmem_to_hbm [thread:$0]  %s104_s12, 128, %s301_s3, [#allocation9]  }
  0x56   :  { %220 = dma.done.wait [#allocation4], 128  }
  0x57   :  { %221 = vsyncadd [#allocation4], 4294967168 }
  0x58   :  { %222 = dma.done.wait [#allocation9], 128  }
  0x59   :  { %223 = vsyncadd [#allocation9], 4294967168 }
  0x5a   :  { %113 = vsyncpa [#allocation3], 1 }
  0x5b   :  { %114 = vsyncpa [#allocation6], 1 }
  0x5c   :  { %115 = vsyncpa [#allocation4], 1 }
  0x5d   :  { %116 = vsyncpa [#allocation9], 1 }

</bundles_post_ra>
